<compile_context>
chip_gen: v7x
topology: tpu7x:2x2x1
jax: 0.10.0
libtpu: 0.0.40
codegen_flags: <defaults>
</compile_context>

<pallas_src>
import functools

import jax
import jax.numpy as jnp
from jax import lax
from jax.experimental import pallas as pl
from jax.experimental.pallas import tpu as pltpu


def get_valid_padding(kernel_size, dilation=1):
    kernel_size = kernel_size + (kernel_size - 1) * (dilation - 1)
    return (kernel_size - 1) // 2


def _pick_batch_tile(N, C):
    """Smallest divisor nb of N with nb*C >= 8 (fill the f32 sublanes per step)."""
    for cand in range(1, N + 1):
        if N % cand == 0 and cand * C >= 8:
            return cand
    return N


def _adaptive_fm_kernel(x_ref, w_ref, b_ref, m_ref, o_ref, *, H, W, K, ipg):
    """One (nb*C, H*W) batch-tile per grid step.

    x_ref : VMEM (R, H*W)          flattened input (also the residual), R = nb*C
    w_ref : VMEM (R, ipg*K*K) f32  grouped conv weight, gamma folded;
                                   column = j*K*K + kh*K + kw (j = in-ch within group)
    b_ref : VMEM (R, 1)       f32  bias, gamma folded
    m_ref : VMEM (K*K, H*W)   f32  per-tap halo validity masks (precomputed)
    o_ref : VMEM (R, H*W)          output
    """
    R = x_ref.shape[0]
    HW = H * W
    KK = K * K
    pad = (K - 1) // 2

    x = x_ref[...].astype(jnp.float32)                     # (R, HW)

    # residual + (gamma-folded) bias
    acc = x + b_ref[...]

    # Hoisted group gather (once per step, not per tap):
    #   xg[j][r, :] = x[r - (r % ipg) + j, :]
    # For AdaptiveFM groups = C//2 so ipg == 2: two sublane rolls + selects (XLU).
    sub = lax.broadcasted_iota(jnp.int32, (R, HW), 0) % ipg
    xg = []
    for j in range(ipg):
        gj = None
        for p in range(ipg):
            shift = (p - j) % R
            src = pltpu.roll(x, shift=shift, axis=0) if shift != 0 else x
            gj = src if gj is None else jnp.where(sub == p, src, gj)
        xg.append(gj)

    # Tap-outer: one lane roll per (tap, j), weight FMA on the whole slab,
    # single mask multiply per non-center tap.
    for kh in range(K):
        for kw in range(K):
            t = kh * K + kw
            d = (kh - pad) * W + (kw - pad)        # flat shift on the (H*W) layout
            tap = None
            for j in range(ipg):
                s = pltpu.roll(xg[j], shift=(-d) % HW, axis=1) if d != 0 else xg[j]
                wcol = w_ref[:, j * KK + t: j * KK + t + 1]     # (R, 1), gamma folded
                contrib = wcol * s
                tap = contrib if tap is None else tap + contrib
            if kh != pad or kw != pad:             # center tap needs no halo mask
                tap = tap * m_ref[t:t + 1, :]
            acc = acc + tap

    o_ref[...] = acc.astype(o_ref.dtype)


def adaptive_fm(x, weight, bias, gamma, *, kernel_size, groups):
    """x: (N, C, H, W). weight: (C, C//groups, K, K). bias: (C,). gamma: (1,)."""
    N, C, H, W = x.shape
    K = kernel_size
    HW = H * W
    pad = get_valid_padding(K, 1)
    ipg = C // groups

    assert C % groups == 0 and weight.shape == (C, ipg, K, K)
    assert HW % 128 == 0, "lane-dense layout requires H*W to be a multiple of 128"
    assert pad < H and pad < W, "flat-shift halo scheme assumes pad < H and pad < W"

    nb = _pick_batch_tile(N, C)     # batch elements per grid step (fills 8 sublanes)
    R = nb * C
    steps = N // nb

    # Fold gamma into weight/bias:  conv(x)*g + x == conv_{w*g}(x) + b*g + x
    g = gamma.astype(jnp.float32).reshape(())
    wflat = (weight.astype(jnp.float32) * g).reshape(C, ipg * K * K)
    w2 = jnp.tile(wflat, (nb, 1))                                   # (R, ipg*K*K)
    b2 = jnp.tile(bias.astype(jnp.float32) * g, nb).reshape(R, 1)   # (R, 1)

    # Precompute per-tap halo masks once in the wrapper (resident, DMA'd once).
    hw = jnp.arange(HW, dtype=jnp.int32)
    row = hw // W
    col = hw % W
    mask_rows = []
    for kh in range(K):
        for kw in range(K):
            dh, dw = kh - pad, kw - pad
            valid = jnp.ones((HW,), dtype=jnp.bool_)
            if dh < 0:
                valid = valid & (row >= -dh)
            if dh > 0:
                valid = valid & (row < H - dh)
            if dw < 0:
                valid = valid & (col >= -dw)
            if dw > 0:
                valid = valid & (col < W - dw)
            mask_rows.append(valid.astype(jnp.float32))
    masks = jnp.stack(mask_rows, axis=0)                            # (K*K, HW)

    # Lane-dense layout: H*W on the lane axis, N*C merged onto the sublane axis.
    x2 = x.reshape(N * C, HW)

    kernel = functools.partial(_adaptive_fm_kernel, H=H, W=W, K=K, ipg=ipg)

    out = pl.pallas_call(
        kernel,
        out_shape=jax.ShapeDtypeStruct((N * C, HW), x.dtype),
        grid_spec=pltpu.PrefetchScalarGridSpec(
            num_scalar_prefetch=0,
            grid=(steps,),
            in_specs=[
                pl.BlockSpec((R, HW), lambda i: (i, 0)),             # x (also residual)
                pl.BlockSpec((R, ipg * K * K), lambda i: (0, 0)),    # weights (resident)
                pl.BlockSpec((R, 1), lambda i: (0, 0)),              # bias (resident)
                pl.BlockSpec((K * K, HW), lambda i: (0, 0)),         # halo masks (resident)
            ],
            out_specs=pl.BlockSpec((R, HW), lambda i: (i, 0)),
        ),
        compiler_params=pltpu.CompilerParams(
            dimension_semantics=("parallel",)),
    )(x2, w2, b2, masks)
    return out.reshape(N, C, H, W)


def adaptive_fm_reference(x, weight, bias, gamma, *, kernel_size, groups):
    pad = get_valid_padding(kernel_size, 1)
    y = lax.conv_general_dilated(
        x, weight,
        window_strides=(1, 1),
        padding=((pad, pad), (pad, pad)),
        dimension_numbers=("NCHW", "OIHW", "NCHW"),
        feature_group_count=groups,
    ) + bias[None, :, None, None]
    return y * gamma + x


if __name__ == "__main__":
    # Module config: AdaptiveFM(in_channel=4, kernel_size=3)
    N, C, H, W = 2, 4, 16, 16
    K = 3
    groups = C // 2

    key = jax.random.PRNGKey(0)
    kx, kw, kb = jax.random.split(key, 3)

    x = jax.random.normal(kx, (N, C, H, W), dtype=jnp.float32)
    # Conv2d(C, C, K, padding=1, groups=C//2): weight (C, C//groups, K, K), bias (C,)
    weight = jax.random.normal(kw, (C, C // groups, K, K), dtype=jnp.float32) * 0.1
    bias = jax.random.normal(kb, (C,), dtype=jnp.float32) * 0.1
    # PyTorch __init__ sets gamma = zeros(1); use a nonzero deterministic value
    # here so the conv path is actually exercised in the test.
    gamma = jnp.array([0.5], dtype=jnp.float32)

    out = adaptive_fm(x, weight, bias, gamma, kernel_size=K, groups=groups)
    out = jax.block_until_ready(out)

    ref = adaptive_fm_reference(x, weight, bias, gamma, kernel_size=K, groups=groups)
    assert out.shape == (N, C, H, W)
    assert jnp.allclose(out, ref, atol=1e-5, rtol=1e-5), \
        f"max abs err {jnp.max(jnp.abs(out - ref))}"

    print("KERNEL_OK")
</pallas_src>

<mosaic_0001>
module attributes {stable_mosaic.version = 11 : i64} {
  func.func @_adaptive_fm_kernel(%arg0: i32, %arg1: memref<8x256xf32, #tpu.memory_space<vmem>>, %arg2: memref<8x18xf32, #tpu.memory_space<vmem>>, %arg3: memref<8x1xf32, #tpu.memory_space<vmem>>, %arg4: memref<9x256xf32, #tpu.memory_space<vmem>>, %arg5: memref<8x256xf32, #tpu.memory_space<vmem>>) attributes {dimension_semantics = [#tpu.dimension_semantics<parallel>], iteration_bounds = array<i64: 1>, scalar_prefetch = 0 : i64, scratch_operands = 0 : i64, tpu.core_type = #tpu.core_type<tc>, window_params = [{transform_indices = @transform_0, window_bounds = array<i64: 8, 256>}, {pipeline_mode = #tpu.pipeline_mode<synchronous>, transform_indices = @transform_1, window_bounds = array<i64: 8, 18>}, {pipeline_mode = #tpu.pipeline_mode<synchronous>, transform_indices = @transform_2, window_bounds = array<i64: 8, 1>}, {pipeline_mode = #tpu.pipeline_mode<synchronous>, transform_indices = @transform_3, window_bounds = array<i64: 9, 256>}, {transform_indices = @transform_4, window_bounds = array<i64: 8, 256>}]} {
    %c0 = arith.constant 0 : index
    %c0_0 = arith.constant 0 : index
    %0 = vector.load %arg1[%c0, %c0_0] : memref<8x256xf32, #tpu.memory_space<vmem>>, vector<8x256xf32>
    %c0_1 = arith.constant 0 : index
    %c0_2 = arith.constant 0 : index
    %1 = vector.load %arg3[%c0_1, %c0_2] : memref<8x1xf32, #tpu.memory_space<vmem>>, vector<8x1xf32>
    %2 = vector.broadcast %1 : vector<8x1xf32> to vector<8x256xf32>
    %3 = arith.addf %0, %2 : vector<8x256xf32>
    %4 = tpu.iota {dimensions = array<i32: 0>} : vector<8x256xi32>
    %c2_i32 = arith.constant 2 : i32
    %c0_i32 = arith.constant 0 : i32
    %5 = arith.cmpi eq, %c2_i32, %c0_i32 : i32
    %c1_i32 = arith.constant 1 : i32
    %6 = arith.select %5, %c1_i32, %c2_i32 : i32
    %7 = vector.broadcast %6 : i32 to vector<8x256xi32>
    %8 = arith.remsi %4, %7 : vector<8x256xi32>
    %c0_i32_3 = arith.constant 0 : i32
    %9 = vector.broadcast %c0_i32_3 : i32 to vector<8x256xi32>
    %10 = arith.cmpi ne, %8, %9 : vector<8x256xi32>
    %c0_i32_4 = arith.constant 0 : i32
    %11 = vector.broadcast %c0_i32_4 : i32 to vector<8x256xi32>
    %12 = arith.cmpi slt, %8, %11 : vector<8x256xi32>
    %c0_i32_5 = arith.constant 0 : i32
    %13 = arith.cmpi slt, %6, %c0_i32_5 : i32
    %14 = vector.broadcast %13 : i1 to vector<8x256xi1>
    %15 = vector.broadcast %14 : vector<8x256xi1> to vector<8x256xi1>
    %16 = arith.xori %12, %15 : vector<8x256xi1>
    %17 = arith.andi %16, %10 : vector<8x256xi1>
    %18 = vector.broadcast %6 : i32 to vector<8x256xi32>
    %19 = arith.addi %8, %18 : vector<8x256xi32>
    %20 = arith.select %17, %19, %8 : vector<8x256xi1>, vector<8x256xi32>
    %c1_i32_6 = arith.constant 1 : i32
    %21 = tpu.dynamic_rotate %0 by %c1_i32_6 dim 0 : vector<8x256xf32>, i32 -> vector<8x256xf32>
    %c1_i32_7 = arith.constant 1 : i32
    %22 = vector.broadcast %c1_i32_7 : i32 to vector<8x256xi32>
    %23 = arith.cmpi eq, %20, %22 : vector<8x256xi32>
    %24 = arith.select %23, %21, %0 : vector<8x256xi1>, vector<8x256xf32>
    %c7_i32 = arith.constant 7 : i32
    %25 = tpu.dynamic_rotate %0 by %c7_i32 dim 0 : vector<8x256xf32>, i32 -> vector<8x256xf32>
    %c1_i32_8 = arith.constant 1 : i32
    %26 = vector.broadcast %c1_i32_8 : i32 to vector<8x256xi32>
    %27 = arith.cmpi eq, %20, %26 : vector<8x256xi32>
    %28 = arith.select %27, %0, %25 : vector<8x256xi1>, vector<8x256xf32>
    %c17_i32 = arith.constant 17 : i32
    %29 = tpu.dynamic_rotate %24 by %c17_i32 dim 1 : vector<8x256xf32>, i32 -> vector<8x256xf32>
    %c0_9 = arith.constant 0 : index
    %c0_10 = arith.constant 0 : index
    %30 = vector.load %arg2[%c0_9, %c0_10] : memref<8x18xf32, #tpu.memory_space<vmem>>, vector<8x1xf32>
    %31 = vector.broadcast %30 : vector<8x1xf32> to vector<8x256xf32>
    %32 = arith.mulf %31, %29 : vector<8x256xf32>
    %c17_i32_11 = arith.constant 17 : i32
    %33 = tpu.dynamic_rotate %28 by %c17_i32_11 dim 1 : vector<8x256xf32>, i32 -> vector<8x256xf32>
    %c0_12 = arith.constant 0 : index
    %c9 = arith.constant 9 : index
    %34 = vector.load %arg2[%c0_12, %c9] : memref<8x18xf32, #tpu.memory_space<vmem>>, vector<8x1xf32>
    %35 = vector.broadcast %34 : vector<8x1xf32> to vector<8x256xf32>
    %36 = arith.mulf %35, %33 : vector<8x256xf32>
    %37 = arith.addf %32, %36 : vector<8x256xf32>
    %c0_13 = arith.constant 0 : index
    %c0_14 = arith.constant 0 : index
    %38 = vector.load %arg4[%c0_13, %c0_14] : memref<9x256xf32, #tpu.memory_space<vmem>>, vector<1x256xf32>
    %39 = vector.broadcast %38 : vector<1x256xf32> to vector<8x256xf32>
    %40 = arith.mulf %37, %39 : vector<8x256xf32>
    %41 = arith.addf %3, %40 : vector<8x256xf32>
    %c16_i32 = arith.constant 16 : i32
    %42 = tpu.dynamic_rotate %24 by %c16_i32 dim 1 : vector<8x256xf32>, i32 -> vector<8x256xf32>
    %c0_15 = arith.constant 0 : index
    %c1 = arith.constant 1 : index
    %43 = vector.load %arg2[%c0_15, %c1] : memref<8x18xf32, #tpu.memory_space<vmem>>, vector<8x1xf32>
    %44 = vector.broadcast %43 : vector<8x1xf32> to vector<8x256xf32>
    %45 = arith.mulf %44, %42 : vector<8x256xf32>
    %c16_i32_16 = arith.constant 16 : i32
    %46 = tpu.dynamic_rotate %28 by %c16_i32_16 dim 1 : vector<8x256xf32>, i32 -> vector<8x256xf32>
    %c0_17 = arith.constant 0 : index
    %c10 = arith.constant 10 : index
    %47 = vector.load %arg2[%c0_17, %c10] : memref<8x18xf32, #tpu.memory_space<vmem>>, vector<8x1xf32>
    %48 = vector.broadcast %47 : vector<8x1xf32> to vector<8x256xf32>
    %49 = arith.mulf %48, %46 : vector<8x256xf32>
    %50 = arith.addf %45, %49 : vector<8x256xf32>
    %c1_18 = arith.constant 1 : index
    %c0_19 = arith.constant 0 : index
    %51 = vector.load %arg4[%c1_18, %c0_19] : memref<9x256xf32, #tpu.memory_space<vmem>>, vector<1x256xf32>
    %52 = vector.broadcast %51 : vector<1x256xf32> to vector<8x256xf32>
    %53 = arith.mulf %50, %52 : vector<8x256xf32>
    %54 = arith.addf %41, %53 : vector<8x256xf32>
    %c15_i32 = arith.constant 15 : i32
    %55 = tpu.dynamic_rotate %24 by %c15_i32 dim 1 : vector<8x256xf32>, i32 -> vector<8x256xf32>
    %c0_20 = arith.constant 0 : index
    %c2 = arith.constant 2 : index
    %56 = vector.load %arg2[%c0_20, %c2] : memref<8x18xf32, #tpu.memory_space<vmem>>, vector<8x1xf32>
    %57 = vector.broadcast %56 : vector<8x1xf32> to vector<8x256xf32>
    %58 = arith.mulf %57, %55 : vector<8x256xf32>
    %c15_i32_21 = arith.constant 15 : i32
    %59 = tpu.dynamic_rotate %28 by %c15_i32_21 dim 1 : vector<8x256xf32>, i32 -> vector<8x256xf32>
    %c0_22 = arith.constant 0 : index
    %c11 = arith.constant 11 : index
    %60 = vector.load %arg2[%c0_22, %c11] : memref<8x18xf32, #tpu.memory_space<vmem>>, vector<8x1xf32>
    %61 = vector.broadcast %60 : vector<8x1xf32> to vector<8x256xf32>
    %62 = arith.mulf %61, %59 : vector<8x256xf32>
    %63 = arith.addf %58, %62 : vector<8x256xf32>
    %c2_23 = arith.constant 2 : index
    %c0_24 = arith.constant 0 : index
    %64 = vector.load %arg4[%c2_23, %c0_24] : memref<9x256xf32, #tpu.memory_space<vmem>>, vector<1x256xf32>
    %65 = vector.broadcast %64 : vector<1x256xf32> to vector<8x256xf32>
    %66 = arith.mulf %63, %65 : vector<8x256xf32>
    %67 = arith.addf %54, %66 : vector<8x256xf32>
    %c1_i32_25 = arith.constant 1 : i32
    %68 = tpu.dynamic_rotate %24 by %c1_i32_25 dim 1 : vector<8x256xf32>, i32 -> vector<8x256xf32>
    %c0_26 = arith.constant 0 : index
    %c3 = arith.constant 3 : index
    %69 = vector.load %arg2[%c0_26, %c3] : memref<8x18xf32, #tpu.memory_space<vmem>>, vector<8x1xf32>
    %70 = vector.broadcast %69 : vector<8x1xf32> to vector<8x256xf32>
    %71 = arith.mulf %70, %68 : vector<8x256xf32>
    %c1_i32_27 = arith.constant 1 : i32
    %72 = tpu.dynamic_rotate %28 by %c1_i32_27 dim 1 : vector<8x256xf32>, i32 -> vector<8x256xf32>
    %c0_28 = arith.constant 0 : index
    %c12 = arith.constant 12 : index
    %73 = vector.load %arg2[%c0_28, %c12] : memref<8x18xf32, #tpu.memory_space<vmem>>, vector<8x1xf32>
    %74 = vector.broadcast %73 : vector<8x1xf32> to vector<8x256xf32>
    %75 = arith.mulf %74, %72 : vector<8x256xf32>
    %76 = arith.addf %71, %75 : vector<8x256xf32>
    %c3_29 = arith.constant 3 : index
    %c0_30 = arith.constant 0 : index
    %77 = vector.load %arg4[%c3_29, %c0_30] : memref<9x256xf32, #tpu.memory_space<vmem>>, vector<1x256xf32>
    %78 = vector.broadcast %77 : vector<1x256xf32> to vector<8x256xf32>
    %79 = arith.mulf %76, %78 : vector<8x256xf32>
    %80 = arith.addf %67, %79 : vector<8x256xf32>
    %c0_31 = arith.constant 0 : index
    %c4 = arith.constant 4 : index
    %81 = vector.load %arg2[%c0_31, %c4] : memref<8x18xf32, #tpu.memory_space<vmem>>, vector<8x1xf32>
    %82 = vector.broadcast %81 : vector<8x1xf32> to vector<8x256xf32>
    %83 = arith.mulf %82, %24 : vector<8x256xf32>
    %c0_32 = arith.constant 0 : index
    %c13 = arith.constant 13 : index
    %84 = vector.load %arg2[%c0_32, %c13] : memref<8x18xf32, #tpu.memory_space<vmem>>, vector<8x1xf32>
    %85 = vector.broadcast %84 : vector<8x1xf32> to vector<8x256xf32>
    %86 = arith.mulf %85, %28 : vector<8x256xf32>
    %87 = arith.addf %83, %86 : vector<8x256xf32>
    %88 = arith.addf %80, %87 : vector<8x256xf32>
    %c255_i32 = arith.constant 255 : i32
    %89 = tpu.dynamic_rotate %24 by %c255_i32 dim 1 : vector<8x256xf32>, i32 -> vector<8x256xf32>
    %c0_33 = arith.constant 0 : index
    %c5 = arith.constant 5 : index
    %90 = vector.load %arg2[%c0_33, %c5] : memref<8x18xf32, #tpu.memory_space<vmem>>, vector<8x1xf32>
    %91 = vector.broadcast %90 : vector<8x1xf32> to vector<8x256xf32>
    %92 = arith.mulf %91, %89 : vector<8x256xf32>
    %c255_i32_34 = arith.constant 255 : i32
    %93 = tpu.dynamic_rotate %28 by %c255_i32_34 dim 1 : vector<8x256xf32>, i32 -> vector<8x256xf32>
    %c0_35 = arith.constant 0 : index
    %c14 = arith.constant 14 : index
    %94 = vector.load %arg2[%c0_35, %c14] : memref<8x18xf32, #tpu.memory_space<vmem>>, vector<8x1xf32>
    %95 = vector.broadcast %94 : vector<8x1xf32> to vector<8x256xf32>
    %96 = arith.mulf %95, %93 : vector<8x256xf32>
    %97 = arith.addf %92, %96 : vector<8x256xf32>
    %c5_36 = arith.constant 5 : index
    %c0_37 = arith.constant 0 : index
    %98 = vector.load %arg4[%c5_36, %c0_37] : memref<9x256xf32, #tpu.memory_space<vmem>>, vector<1x256xf32>
    %99 = vector.broadcast %98 : vector<1x256xf32> to vector<8x256xf32>
    %100 = arith.mulf %97, %99 : vector<8x256xf32>
    %101 = arith.addf %88, %100 : vector<8x256xf32>
    %c241_i32 = arith.constant 241 : i32
    %102 = tpu.dynamic_rotate %24 by %c241_i32 dim 1 : vector<8x256xf32>, i32 -> vector<8x256xf32>
    %c0_38 = arith.constant 0 : index
    %c6 = arith.constant 6 : index
    %103 = vector.load %arg2[%c0_38, %c6] : memref<8x18xf32, #tpu.memory_space<vmem>>, vector<8x1xf32>
    %104 = vector.broadcast %103 : vector<8x1xf32> to vector<8x256xf32>
    %105 = arith.mulf %104, %102 : vector<8x256xf32>
    %c241_i32_39 = arith.constant 241 : i32
    %106 = tpu.dynamic_rotate %28 by %c241_i32_39 dim 1 : vector<8x256xf32>, i32 -> vector<8x256xf32>
    %c0_40 = arith.constant 0 : index
    %c15 = arith.constant 15 : index
    %107 = vector.load %arg2[%c0_40, %c15] : memref<8x18xf32, #tpu.memory_space<vmem>>, vector<8x1xf32>
    %108 = vector.broadcast %107 : vector<8x1xf32> to vector<8x256xf32>
    %109 = arith.mulf %108, %106 : vector<8x256xf32>
    %110 = arith.addf %105, %109 : vector<8x256xf32>
    %c6_41 = arith.constant 6 : index
    %c0_42 = arith.constant 0 : index
    %111 = vector.load %arg4[%c6_41, %c0_42] : memref<9x256xf32, #tpu.memory_space<vmem>>, vector<1x256xf32>
    %112 = vector.broadcast %111 : vector<1x256xf32> to vector<8x256xf32>
    %113 = arith.mulf %110, %112 : vector<8x256xf32>
    %114 = arith.addf %101, %113 : vector<8x256xf32>
    %c240_i32 = arith.constant 240 : i32
    %115 = tpu.dynamic_rotate %24 by %c240_i32 dim 1 : vector<8x256xf32>, i32 -> vector<8x256xf32>
    %c0_43 = arith.constant 0 : index
    %c7 = arith.constant 7 : index
    %116 = vector.load %arg2[%c0_43, %c7] : memref<8x18xf32, #tpu.memory_space<vmem>>, vector<8x1xf32>
    %117 = vector.broadcast %116 : vector<8x1xf32> to vector<8x256xf32>
    %118 = arith.mulf %117, %115 : vector<8x256xf32>
    %c240_i32_44 = arith.constant 240 : i32
    %119 = tpu.dynamic_rotate %28 by %c240_i32_44 dim 1 : vector<8x256xf32>, i32 -> vector<8x256xf32>
    %c0_45 = arith.constant 0 : index
    %c16 = arith.constant 16 : index
    %120 = vector.load %arg2[%c0_45, %c16] : memref<8x18xf32, #tpu.memory_space<vmem>>, vector<8x1xf32>
    %121 = vector.broadcast %120 : vector<8x1xf32> to vector<8x256xf32>
    %122 = arith.mulf %121, %119 : vector<8x256xf32>
    %123 = arith.addf %118, %122 : vector<8x256xf32>
    %c7_46 = arith.constant 7 : index
    %c0_47 = arith.constant 0 : index
    %124 = vector.load %arg4[%c7_46, %c0_47] : memref<9x256xf32, #tpu.memory_space<vmem>>, vector<1x256xf32>
    %125 = vector.broadcast %124 : vector<1x256xf32> to vector<8x256xf32>
    %126 = arith.mulf %123, %125 : vector<8x256xf32>
    %127 = arith.addf %114, %126 : vector<8x256xf32>
    %c239_i32 = arith.constant 239 : i32
    %128 = tpu.dynamic_rotate %24 by %c239_i32 dim 1 : vector<8x256xf32>, i32 -> vector<8x256xf32>
    %c0_48 = arith.constant 0 : index
    %c8 = arith.constant 8 : index
    %129 = vector.load %arg2[%c0_48, %c8] : memref<8x18xf32, #tpu.memory_space<vmem>>, vector<8x1xf32>
    %130 = vector.broadcast %129 : vector<8x1xf32> to vector<8x256xf32>
    %131 = arith.mulf %130, %128 : vector<8x256xf32>
    %c239_i32_49 = arith.constant 239 : i32
    %132 = tpu.dynamic_rotate %28 by %c239_i32_49 dim 1 : vector<8x256xf32>, i32 -> vector<8x256xf32>
    %c0_50 = arith.constant 0 : index
    %c17 = arith.constant 17 : index
    %133 = vector.load %arg2[%c0_50, %c17] : memref<8x18xf32, #tpu.memory_space<vmem>>, vector<8x1xf32>
    %134 = vector.broadcast %133 : vector<8x1xf32> to vector<8x256xf32>
    %135 = arith.mulf %134, %132 : vector<8x256xf32>
    %136 = arith.addf %131, %135 : vector<8x256xf32>
    %c8_51 = arith.constant 8 : index
    %c0_52 = arith.constant 0 : index
    %137 = vector.load %arg4[%c8_51, %c0_52] : memref<9x256xf32, #tpu.memory_space<vmem>>, vector<1x256xf32>
    %138 = vector.broadcast %137 : vector<1x256xf32> to vector<8x256xf32>
    %139 = arith.mulf %136, %138 : vector<8x256xf32>
    %140 = arith.addf %127, %139 : vector<8x256xf32>
    %c0_53 = arith.constant 0 : index
    %c0_54 = arith.constant 0 : index
    %141 = vector.load %arg5[%c0_53, %c0_54] : memref<8x256xf32, #tpu.memory_space<vmem>>, vector<8x256xf32>
    tpu.vector_store %arg5[%c0_53, %c0_54], %140 {strides = array<i32>} : memref<8x256xf32, #tpu.memory_space<vmem>>, vector<8x256xf32>,
    return
  }
  func.func @transform_0(%arg0: i32) -> (i32, i32) {
    %c0_i32 = arith.constant 0 : i32
    %c0_i32_0 = arith.constant 0 : i32
    return %arg0, %c0_i32 : i32, i32
  }
  func.func @transform_1(%arg0: i32) -> (i32, i32) {
    %c0_i32 = arith.constant 0 : i32
    %c0_i32_0 = arith.constant 0 : i32
    %c0_i32_1 = arith.constant 0 : i32
    return %c0_i32, %c0_i32_0 : i32, i32
  }
  func.func @transform_2(%arg0: i32) -> (i32, i32) {
    %c0_i32 = arith.constant 0 : i32
    %c0_i32_0 = arith.constant 0 : i32
    %c0_i32_1 = arith.constant 0 : i32
    return %c0_i32, %c0_i32_0 : i32, i32
  }
  func.func @transform_3(%arg0: i32) -> (i32, i32) {
    %c0_i32 = arith.constant 0 : i32
    %c0_i32_0 = arith.constant 0 : i32
    %c0_i32_1 = arith.constant 0 : i32
    return %c0_i32, %c0_i32_0 : i32, i32
  }
  func.func @transform_4(%arg0: i32) -> (i32, i32) {
    %c0_i32 = arith.constant 0 : i32
    %c0_i32_0 = arith.constant 0 : i32
    return %arg0, %c0_i32 : i32, i32
  }
}

</mosaic_0001>

<bundles_post_ra>
// kernel: tpu_custom_call.1
= control target key start
LH: loop header
LB: loop body
LE: loop exit
PB: predicated region body
PF: predicated region fallthrough
CT: control target
= control target key end

     0   :  { %9 = vsyncpa [#allocation3], 0  ;;  %s844_s0 = inlined_call_operand.hbm [shape: f32[8,256], index: 0, kind: input, shape index: {}]   ;;  %s845_s1 = inlined_call_operand.vmem [shape: f32[8,18], index: 1, kind: input, shape index: {}]   ;;  %s846_s2 = inlined_call_operand.vmem [shape: f32[8,1], index: 2, kind: input, shape index: {}]   ;;  %s847_s3 = inlined_call_operand.hbm [shape: f32[9,256], index: 3, kind: input, shape index: {}]   ;;  %s848_s4 = inlined_call_operand.hbm [shape: f32[8,256], index: 4, kind: output, shape index: {}]  }
   0x1   :  { %10 = vsyncpa [#allocation6], 0 }
   0x2   :  { %11 = vsyncpa [#allocation4], 0  ;;  %s588_s15 = smov [#allocation2]   ;;  %s589_s17 = smov [#allocation5]  }
   0x3   :  { %s18_s16 = sshll.u32 %s588_s15, 4  ;;  %s31_s18 = sshll.u32 %s589_s17, 4  ;;  %s19_s16 = int_to_ptr.vmem [resolvable:$true] %s18_s16  ;;  %s643_s18 = int_to_ptr.vmem [resolvable:$true] %s31_s18 }
   0x4   :  { %s516_s21 = scalar_lea.hbm %s844_s0, 256 }
   0x5   :  { %p517_p0 = scmp.ne.s32.totalorder %s844_s0, %s516_s21  ;;  %p520_p1 = scmp.lt.u32.totalorder %s516_s21, %s844_s0 }
   0x7   :  { %p522_p2 = pnand %p520_p1, %p517_p0 }
   0x9   :  { %525 = shalt.err (!%p522_p2)
}
   0xa   :  { %s526_s26 = scalar_lea.vmem %s19_s16, 256  ;;  %p531_p4 = scmp.lt.s32.totalorder %s19_s16, %s19_s16 }
   0xb   :  { %p527_p3 = scmp.ne.s32.totalorder %s19_s16, %s526_s26  ;;  %p532_p5 = scmp.lt.s32.totalorder %s526_s26, %s526_s26 }
   0xd   :  { %p533_p6 = por %p532_p5, %p531_p4 }
   0xf   :  { %p534_p7 = pnand %p533_p6, %p527_p3 }
  0x11   :  { %537 = shalt.err (!%p534_p7)
}
  0x12   :  { %21 = dma.hbm_to_vmem [thread:$0]  %s844_s0, 256, %s19_s16, [#allocation3]  }
  0x13   :  { %s538_s5 = scalar_lea.hbm %s847_s3, 512 }
  0x14   :  { %p539_p8 = scmp.ne.s32.totalorder %s847_s3, %s538_s5  ;;  %p542_p9 = scmp.lt.u32.totalorder %s538_s5, %s847_s3 }
  0x16   :  { %p544_p10 = pnand %p542_p9, %p539_p8 }
  0x18   :  { %547 = shalt.err (!%p544_p10)
}
  0x19   :  { %s548_s10 = scalar_lea.vmem %s643_s18, 512  ;;  %p553_p12 = scmp.lt.s32.totalorder %s643_s18, %s643_s18 }
  0x1a   :  { %p549_p11 = scmp.ne.s32.totalorder %s643_s18, %s548_s10  ;;  %p554_p13 = scmp.lt.s32.totalorder %s548_s10, %s548_s10 }
  0x1c   :  { %p555_p0 = por %p554_p13, %p553_p12 }
  0x1e   :  { %p556_p1 = pnand %p555_p0, %p549_p11 }
  0x20   :  { %559 = shalt.err (!%p556_p1)
}
  0x21   :  { %s590_s0 = smov 256   ;;  %s591_s11 = smov 16  }
  0x22   :  { %37 = dma.hbm_to_vmem [thread:$0]  %s847_s3, 512, %s643_s18, [#allocation6], %s590_s0, %s590_s0, %s591_s11  }
  0x23   :  { %582 = dma.done.wait [#allocation3], 256  }
  0x24   :  { %583 = vsyncadd [#allocation3], 4294967040 }
  0x25   :  { %584 = dma.done.wait [#allocation6], 512  }
  0x26   :  { %585 = vsyncadd [#allocation6], 4294966784  ;;  %v54_v0 = vlaneseq  ;;  %v592_v1 = vmov 0   ;;  %v682_v4 = vld [vmem:[%s845_s1] sm:$0xff]  ;;  %v687_v6 = vld [vmem:[#allocation2 + $0x8] sm:$0xff]  ;;  %s593_s1 = smov 17  }
  0x27   :  { %497 = vset.pattern.permute.xlu1 %v592_v1  ;;  %496 = vset.pattern.permute.xlu0 %v592_v1  ;;  %v46_v5 = vld [vmem:[%s846_s2] sm:$0xff]  ;;  %v69_v7 = vrot.slane %v687_v6, 7  ;;  %v74_v10 = vrot.slane %v687_v6, 1  ;;  %v594_v16 = vmov 9   ;;  %v595_v17 = vmov 12   ;;  %s599_s2 = smov 15  }
  0x28   :  { %v676_v2 = vshrl.u32 %v54_v0, 7  ;;  %89 = vperm.xlu1 %497, %v682_v4   ;;  %49 = vperm.xlu0 %496, %v46_v5   ;;  %v691_v8 = vld [vmem:[#allocation2] sm:$0xff]  ;;  %v596_v18 = vmov 1   ;;  %v597_v19 = vmov 10   ;;  %v598_v20 = vmov 2   ;;  %s603_s17 = smov 1  }
  0x29   :  { %v68_v9 = vrot.slane %v691_v8, 7  ;;  %v73_v11 = vrot.slane %v691_v8, 1  ;;  %v600_v21 = vmov 11   ;;  %v601_v22 = vmov 3   ;;  %s607_s18 = smov 127   ;;  %s611_s19 = smov 113  }
  0x2a   :  { %v60_v3 = vand.u32 1, %v676_v2  ;;  %v602_v23 = vmov 13   ;;  %v604_v24 = vmov 6   ;;  %v605_v25 = vmov 16   ;;  %s614_s20 = smov 112   ;;  %s616_s21 = smov 111  }
  0x2b   :  { %v606_v26 = vmov 4   ;;  %v608_v27 = vmov 8   ;;  %v609_v28 = vmov 5   ;;  %v610_v29 = vmov 14   ;;  %s617_s22 = smov [#allocation7]  }
  0x2c   :  { %vm70_vm0 = vcmp.eq.s32.totalorder %v60_v3, 1  ;;  %498 = vset.pattern.permute.xlu0 %v594_v16  ;;  %504 = vset.pattern.permute.xlu1 %v595_v17  ;;  %v612_v30 = vmov 17   ;;  %v613_v31 = vmov 15   ;;  %v615_v32 = vmov 7   ;;  %s456_s23 = sshll.u32 %s617_s22, 4  ;;  %s457_s23 = int_to_ptr.vmem [resolvable:$true] %s456_s23 }
  0x2d   :  { %v697_v12 = vsel %vm70_vm0, %v69_v7, %v687_v6  ;;  %v700_v13 = vsel %vm70_vm0, %v68_v9, %v691_v8  ;;  %v705_v14 = vsel %vm70_vm0, %v687_v6, %v74_v10  ;;  %v708_v15 = vsel %vm70_vm0, %v691_v8, %v73_v11  ;;  %v108_v48 = vld [vmem:[#allocation5] ss:$8 sm:$0x3]  ;;  %s560_s24 = scalar_lea.vmem %s457_s23, 256  ;;  %p565_p3 = scmp.lt.s32.totalorder %s457_s23, %s457_s23 }
  0x2e   :  { %79 = vrot.lane.b32.xlu1 %v697_v12, %s593_s1  ;;  %77 = vrot.lane.b32.xlu0 %v700_v13, %s593_s1  ;;  %v766_v33 = vand.u32 127, %v54_v0  ;;  %v770_v44 = vsub.s32 0, %v676_v2  ;;  %v773_v45 = vsub.s32 1, %v676_v2  ;;  %p561_p2 = scmp.ne.s32.totalorder %s457_s23, %s560_s24  ;;  %p566_p4 = scmp.lt.s32.totalorder %s560_s24, %s560_s24 }
  0x30   :  { %vm83_vm1 = vcmp.lt.s32.totalorder %v766_v33, 17  ;;  %v113_v51 = vrot.slane %v108_v48, %v770_v44  ;;  %v117_v52 = vrot.slane %v108_v48, %v773_v45  ;;  %vm128_vm2 = vcmp.lt.s32.totalorder %v766_v33, 16  ;;  %p567_p5 = por %p566_p4, %p565_p3 }
  0x31   :  { %vm172_vm3 = vcmp.lt.s32.totalorder %v766_v33, 15  ;;  %vm216_vm4 = vcmp.lt.s32.totalorder %v766_v33, 1  ;;  %vm276_vm5 = vcmp.lt.s32.totalorder %v766_v33, 127  ;;  %vm320_vm6 = vcmp.lt.s32.totalorder %v766_v33, 113 }
  0x32   :  { %96 = vrot.lane.b32.xlu1 %v705_v14, %s593_s1  ;;  %94 = vrot.lane.b32.xlu0 %v708_v15, %s593_s1  ;;  %vm364_vm7 = vcmp.lt.s32.totalorder %v766_v33, 112  ;;  %vm408_vm8 = vcmp.lt.s32.totalorder %v766_v33, 111  ;;  %p568_p6 = pnand %p567_p5, %p561_p2 }
  0x36   :  { %124 = vrot.lane.b32.xlu1 %v700_v13, %s591_s11  ;;  %101 = vperm.xlu0 %498, %v682_v4  }
  0x3a   :  { %126 = vrot.lane.b32.xlu1 %v697_v12, %s591_s11  ;;  %499 = vset.pattern.permute.xlu0 %v596_v18 }
  0x3b   :  { %132 = vperm.xlu0 %499, %v682_v4  }
  0x3e   :  { %137 = vrot.lane.b32.xlu1 %v708_v15, %s591_s11 }
  0x3f   :  { %500 = vset.pattern.permute.xlu0 %v597_v19 }
  0x40   :  { %144 = vperm.xlu0 %500, %v682_v4  }
  0x42   :  { %139 = vrot.lane.b32.xlu1 %v705_v14, %s591_s11 }
  0x44   :  { %501 = vset.pattern.permute.xlu0 %v598_v20 }
  0x45   :  { %176 = vperm.xlu0 %501, %v682_v4  }
  0x46   :  { %168 = vrot.lane.b32.xlu1 %v700_v13, %s599_s2 }
  0x49   :  { %502 = vset.pattern.permute.xlu0 %v600_v21 }
  0x4a   :  { %170 = vrot.lane.b32.xlu1 %v697_v12, %s599_s2  ;;  %188 = vperm.xlu0 %502, %v682_v4  }
  0x4e   :  { %181 = vrot.lane.b32.xlu1 %v708_v15, %s599_s2  ;;  %503 = vset.pattern.permute.xlu0 %v601_v22 }
  0x4f   :  { %220 = vperm.xlu0 %503, %v682_v4  }
  0x52   :  { %183 = vrot.lane.b32.xlu1 %v705_v14, %s599_s2 }
  0x53   :  { %506 = vset.pattern.permute.xlu0 %v602_v23 }
  0x54   :  { %263 = vperm.xlu0 %506, %v682_v4  }
  0x56   :  { %212 = vrot.lane.b32.xlu1 %v700_v13, %s603_s17 }
  0x58   :  { %225 = vrot.lane.b32.xlu0 %v708_v15, %s603_s17 }
  0x59   :  { %509 = vset.pattern.permute.xlu0 %v604_v24 }
  0x5a   :  { %214 = vrot.lane.b32.xlu1 %v697_v12, %s603_s17 }
  0x5c   :  { %324 = vperm.xlu0 %509, %v682_v4  }
  0x5e   :  { %232 = vperm.xlu1 %504, %v682_v4  }
  0x60   :  { %512 = vset.pattern.permute.xlu0 %v605_v25 }
  0x61   :  { %380 = vperm.xlu0 %512, %v682_v4  }
  0x62   :  { %505 = vset.pattern.permute.xlu1 %v606_v26 }
  0x63   :  { %257 = vperm.xlu1 %505, %v682_v4  }
  0x65   :  { %285 = vrot.lane.b32.xlu0 %v708_v15, %s607_s18 }
  0x66   :  { %513 = vset.pattern.permute.xlu0 %v608_v27 }
  0x67   :  { %507 = vset.pattern.permute.xlu1 %v609_v28 }
  0x68   :  { %280 = vperm.xlu1 %507, %v682_v4  }
  0x69   :  { %412 = vperm.xlu0 %513, %v682_v4  }
  0x6c   :  { %508 = vset.pattern.permute.xlu1 %v610_v29 }
  0x6d   :  { %292 = vperm.xlu1 %508, %v682_v4   ;;  %318 = vrot.lane.b32.xlu0 %v697_v12, %s611_s19 }
  0x6e   :  { %515 = vset.pattern.permute.xlu0 %v612_v30 }
  0x71   :  { %227 = vrot.lane.b32.xlu1 %v705_v14, %s603_s17  ;;  %331 = vrot.lane.b32.xlu0 %v705_v14, %s611_s19 }
  0x72   :  { %510 = vset.pattern.permute.xlu1 %v613_v31  ;;  %v196_v31 = vld [vmem:[#allocation5 + $0x2] ss:$8 sm:$0x3] }
  0x75   :  { %336 = vperm.xlu1 %510, %v682_v4   ;;  %362 = vrot.lane.b32.xlu0 %v697_v12, %s614_s20 }
  0x79   :  { %511 = vset.pattern.permute.xlu1 %v615_v32  ;;  %375 = vrot.lane.b32.xlu0 %v705_v14, %s614_s20 }
  0x7a   :  { %368 = vperm.xlu1 %511, %v682_v4  }
  0x7d   :  { %406 = vrot.lane.b32.xlu0 %v697_v12, %s616_s21 }
  0x7e   :  { %272 = vrot.lane.b32.xlu1 %v700_v13, %s607_s18 }
  0x7f   :  { %514 = vset.pattern.permute.xlu1 %v612_v30 }
  0x81   :  { %419 = vrot.lane.b32.xlu0 %v705_v14, %s616_s21 }
  0x82   :  { %274 = vrot.lane.b32.xlu1 %v697_v12, %s607_s18 }
  0x86   :  { %287 = vrot.lane.b32.xlu1 %v705_v14, %s607_s18 }
  0x8a   :  { %424 = vperm.xlu1 %514, %v682_v4   ;;  %v152_v4 = vld [vmem:[#allocation5 + $0x1] ss:$8 sm:$0x3] }
  0x8b   :  { %v157_v9 = vrot.slane %v152_v4, %v770_v44  ;;  %v161_v10 = vrot.slane %v152_v4, %v773_v45 }
  0x8e   :  { %316 = vrot.lane.b32.xlu1 %v700_v13, %s611_s19 }
  0x92   :  { %329 = vrot.lane.b32.xlu1 %v708_v15, %s611_s19 }
  0x96   :  { %360 = vrot.lane.b32.xlu1 %v700_v13, %s614_s20 }
  0x9a   :  { %373 = vrot.lane.b32.xlu1 %v708_v15, %s614_s20 }
  0x9e   :  { %404 = vrot.lane.b32.xlu1 %v700_v13, %s616_s21 }
  0xa2   :  { %417 = vrot.lane.b32.xlu1 %v708_v15, %s616_s21 }
  0xa7   :  { %v90_v34 = vpop.permute.xlu1 %89  ;;  %v50_v35 = vpop.permute.xlu0 %49 }
  0xa8   :  { %v52_v55 = vadd.f32 %v50_v35, %v691_v8  ;;  %v53_v56 = vadd.f32 %v50_v35, %v687_v6 }
  0xab   :  { %v80_v36 = vpop.permute.xlu1 %79  ;;  %v78_v37 = vpop.permute.xlu0 %77 }
  0xac   :  { %v84_v38 = vsel %vm83_vm1, %v78_v37, %v80_v36  ;;  %v85_v39 = vsel %vm83_vm1, %v80_v36, %v78_v37  ;;  %v201_v37 = vrot.slane %v196_v31, %v770_v44 }
  0xad   :  { %v92_v40 = vmul.f32 %v90_v34, %v85_v39  ;;  %v93_v41 = vmul.f32 %v90_v34, %v84_v38  ;;  %v205_v38 = vrot.slane %v196_v31, %v773_v45 }
  0xaf   :  { %v97_v42 = vpop.permute.xlu1 %96  ;;  %v95_v43 = vpop.permute.xlu0 %94 }
  0xb0   :  { %v98_v46 = vsel %vm83_vm1, %v95_v43, %v97_v42  ;;  %v99_v47 = vsel %vm83_vm1, %v97_v42, %v95_v43 }
  0xb3   :  { %v125_v49 = vpop.permute.xlu1 %124 }
  0xb5   :  { %v102_v50 = vpop.permute.xlu0 %101 }
  0xb6   :  { %v104_v53 = vmul.f32 %v102_v50, %v99_v47  ;;  %v105_v54 = vmul.f32 %v102_v50, %v98_v46 }
  0xb7   :  { %v127_v59 = vpop.permute.xlu1 %126 }
  0xb8   :  { %v106_v57 = vadd.f32 %v104_v53, %v92_v40  ;;  %v107_v58 = vadd.f32 %v105_v54, %v93_v41  ;;  %v129_v62 = vsel %vm128_vm2, %v125_v49, %v127_v59  ;;  %v130_v63 = vsel %vm128_vm2, %v127_v59, %v125_v49 }
  0xba   :  { %v120_v60 = vmul.f32 %v113_v51, %v106_v57  ;;  %v121_v61 = vmul.f32 %v117_v52, %v107_v58  ;;  %v133_v2 = vpop.permute.xlu0 %132 }
  0xbb   :  { %v138_v3 = vpop.permute.xlu1 %137  ;;  %v135_v11 = vmul.f32 %v133_v2, %v130_v63  ;;  %v136_v16 = vmul.f32 %v133_v2, %v129_v62 }
  0xbc   :  { %v122_v0 = vadd.f32 %v120_v60, %v52_v55  ;;  %v123_v1 = vadd.f32 %v121_v61, %v53_v56  ;;  %v240_v61 = vld [vmem:[#allocation5 + $0x3] ss:$8 sm:$0x3] }
  0xbd   :  { %v249_v2 = vrot.slane %v240_v61, %v773_v45 }
  0xbf   :  { %v145_v5 = vpop.permute.xlu0 %144  ;;  %v140_v7 = vpop.permute.xlu1 %139 }
  0xc0   :  { %v141_v6 = vsel %vm128_vm2, %v138_v3, %v140_v7  ;;  %v142_v8 = vsel %vm128_vm2, %v140_v7, %v138_v3 }
  0xc1   :  { %v147_v17 = vmul.f32 %v145_v5, %v142_v8  ;;  %v148_v18 = vmul.f32 %v145_v5, %v141_v6 }
  0xc3   :  { %v149_v19 = vadd.f32 %v147_v17, %v135_v11  ;;  %v150_v20 = vadd.f32 %v148_v18, %v136_v16  ;;  %v169_v21 = vpop.permute.xlu1 %168 }
  0xc4   :  { %v177_v29 = vpop.permute.xlu0 %176 }
  0xc5   :  { %v164_v22 = vmul.f32 %v157_v9, %v149_v19  ;;  %v165_v23 = vmul.f32 %v161_v10, %v150_v20 }
  0xc7   :  { %v166_v24 = vadd.f32 %v164_v22, %v122_v0  ;;  %v167_v25 = vadd.f32 %v165_v23, %v123_v1  ;;  %v171_v26 = vpop.permute.xlu1 %170  ;;  %v245_v1 = vrot.slane %v240_v61, %v770_v44 }
  0xc8   :  { %v173_v27 = vsel %vm172_vm3, %v169_v21, %v171_v26  ;;  %v174_v28 = vsel %vm172_vm3, %v171_v26, %v169_v21 }
  0xc9   :  { %v189_v32 = vpop.permute.xlu0 %188  ;;  %v179_v39 = vmul.f32 %v177_v29, %v174_v28  ;;  %v180_v40 = vmul.f32 %v177_v29, %v173_v27  ;;  %v300_v27 = vld [vmem:[#allocation5 + $0x5] ss:$8 sm:$0x3] }
  0xcb   :  { %v182_v30 = vpop.permute.xlu1 %181 }
  0xce   :  { %v221_v53 = vpop.permute.xlu0 %220 }
  0xcf   :  { %v184_v34 = vpop.permute.xlu1 %183 }
  0xd0   :  { %v185_v35 = vsel %vm172_vm3, %v182_v30, %v184_v34  ;;  %v186_v36 = vsel %vm172_vm3, %v184_v34, %v182_v30 }
  0xd1   :  { %v191_v41 = vmul.f32 %v189_v32, %v186_v36  ;;  %v192_v42 = vmul.f32 %v189_v32, %v185_v35  ;;  %v305_v36 = vrot.slane %v300_v27, %v770_v44 }
  0xd3   :  { %v193_v43 = vadd.f32 %v191_v41, %v179_v39  ;;  %v194_v46 = vadd.f32 %v192_v42, %v180_v40  ;;  %v213_v47 = vpop.permute.xlu1 %212  ;;  %v264_v55 = vpop.permute.xlu0 %263 }
  0xd4   :  { %v266_v32 = vmul.f32 %v264_v55, %v708_v15  ;;  %v267_v34 = vmul.f32 %v264_v55, %v705_v14 }
  0xd5   :  { %v208_v48 = vmul.f32 %v201_v37, %v193_v43  ;;  %v209_v49 = vmul.f32 %v205_v38, %v194_v46  ;;  %v309_v37 = vrot.slane %v300_v27, %v773_v45 }
  0xd7   :  { %v210_v50 = vadd.f32 %v208_v48, %v166_v24  ;;  %v211_v51 = vadd.f32 %v209_v49, %v167_v25  ;;  %v215_v52 = vpop.permute.xlu1 %214  ;;  %v226_v57 = vpop.permute.xlu0 %225 }
  0xd8   :  { %v217_v62 = vsel %vm216_vm4, %v213_v47, %v215_v52  ;;  %v218_v63 = vsel %vm216_vm4, %v215_v52, %v213_v47 }
  0xd9   :  { %v223_v7 = vmul.f32 %v221_v53, %v218_v63  ;;  %v224_v6 = vmul.f32 %v221_v53, %v217_v62 }
  0xdb   :  { %v793_v59 = vpop.permute.xlu0 %324 }
  0xdd   :  { %v233_v54 = vpop.permute.xlu1 %232 }
  0xe0   :  { %v798_v5 = vpop.permute.xlu0 %380 }
  0xe2   :  { %v258_v56 = vpop.permute.xlu1 %257 }
  0xe3   :  { %v260_v30 = vmul.f32 %v258_v56, %v700_v13  ;;  %v261_v31 = vmul.f32 %v258_v56, %v697_v12  ;;  %v344_v56 = vld [vmem:[#allocation5 + $0x6] ss:$8 sm:$0x3] }
  0xe4   :  { %v286_v19 = vpop.permute.xlu0 %285  ;;  %v349_v61 = vrot.slane %v344_v56, %v770_v44  ;;  %v353_v62 = vrot.slane %v344_v56, %v773_v45 }
  0xe5   :  { %v268_v47 = vadd.f32 %v266_v32, %v260_v30  ;;  %v269_v13 = vadd.f32 %v267_v34, %v261_v31 }
  0xe7   :  { %v281_v58 = vpop.permute.xlu1 %280 }
  0xe8   :  { %v802_v23 = vpop.permute.xlu0 %412 }
  0xec   :  { %v293_v60 = vpop.permute.xlu1 %292  ;;  %v319_v26 = vpop.permute.xlu0 %318 }
  0xf0   :  { %v228_v0 = vpop.permute.xlu1 %227  ;;  %v332_v46 = vpop.permute.xlu0 %331 }
  0xf1   :  { %v229_v3 = vsel %vm216_vm4, %v226_v57, %v228_v0  ;;  %v230_v4 = vsel %vm216_vm4, %v228_v0, %v226_v57 }
  0xf2   :  { %v235_v8 = vmul.f32 %v233_v54, %v230_v4  ;;  %v236_v9 = vmul.f32 %v233_v54, %v229_v3 }
  0xf4   :  { %v237_v10 = vadd.f32 %v235_v8, %v223_v7  ;;  %v238_v11 = vadd.f32 %v236_v9, %v224_v6  ;;  %v337_v16 = vpop.permute.xlu1 %336  ;;  %v363_v55 = vpop.permute.xlu0 %362 }
  0xf6   :  { %v252_v17 = vmul.f32 %v245_v1, %v237_v10  ;;  %v253_v18 = vmul.f32 %v249_v2, %v238_v11 }
  0xf8   :  { %v254_v20 = vadd.f32 %v252_v17, %v210_v50  ;;  %v255_v21 = vadd.f32 %v253_v18, %v211_v51  ;;  %v376_v7 = vpop.permute.xlu0 %375  ;;  %v388_v17 = vld [vmem:[#allocation5 + $0x7] ss:$8 sm:$0x3] }
  0xf9   :  { %v800_v22 = vpop.permute.xlu1 %368 }
  0xfa   :  { %v270_v15 = vadd.f32 %v268_v47, %v254_v20  ;;  %v271_v14 = vadd.f32 %v269_v13, %v255_v21 }
  0xfd   :  { %v273_v24 = vpop.permute.xlu1 %272 }
 0x101   :  { %v275_v25 = vpop.permute.xlu1 %274 }
 0x102   :  { %v277_v28 = vsel %vm276_vm5, %v273_v24, %v275_v25  ;;  %v278_v29 = vsel %vm276_vm5, %v275_v25, %v273_v24  ;;  %v407_v25 = vpop.permute.xlu0 %406 }
 0x103   :  { %v283_v40 = vmul.f32 %v281_v58, %v277_v28  ;;  %v284_v41 = vmul.f32 %v281_v58, %v278_v29 }
 0x105   :  { %v288_v35 = vpop.permute.xlu1 %287 }
 0x106   :  { %v289_v38 = vsel %vm276_vm5, %v286_v19, %v288_v35  ;;  %v290_v39 = vsel %vm276_vm5, %v288_v35, %v286_v19 }
 0x107   :  { %v295_v42 = vmul.f32 %v293_v60, %v289_v38  ;;  %v296_v43 = vmul.f32 %v293_v60, %v290_v39  ;;  %v432_v38 = vld [vmem:[#allocation5 + $0x10] ss:$8 sm:$0x3]  ;;  %v420_v39 = vpop.permute.xlu0 %419 }
 0x108   :  { %v441_v47 = vrot.slane %v432_v38, %v773_v45 }
 0x109   :  { %v297_v48 = vadd.f32 %v295_v42, %v283_v40  ;;  %v298_v12 = vadd.f32 %v296_v43, %v284_v41  ;;  %v811_v49 = vpop.permute.xlu1 %424 }
 0x10b   :  { %v312_v50 = vmul.f32 %v305_v36, %v297_v48  ;;  %v313_v51 = vmul.f32 %v309_v37, %v298_v12 }
 0x10d   :  { %v314_v52 = vadd.f32 %v312_v50, %v270_v15  ;;  %v315_v53 = vadd.f32 %v313_v51, %v271_v14  ;;  %v317_v54 = vpop.permute.xlu1 %316 }
 0x10e   :  { %v321_v57 = vsel %vm320_vm6, %v317_v54, %v319_v26  ;;  %v322_v58 = vsel %vm320_vm6, %v319_v26, %v317_v54  ;;  %v393_v26 = vrot.slane %v388_v17, %v770_v44 }
 0x10f   :  { %v327_v1 = vmul.f32 %v793_v59, %v321_v57  ;;  %v328_v2 = vmul.f32 %v793_v59, %v322_v58  ;;  %v397_v59 = vrot.slane %v388_v17, %v773_v45 }
 0x111   :  { %v330_v60 = vpop.permute.xlu1 %329 }
 0x112   :  { %v333_v63 = vsel %vm320_vm6, %v330_v60, %v332_v46  ;;  %v334_v0 = vsel %vm320_vm6, %v332_v46, %v330_v60 }
 0x113   :  { %v339_v3 = vmul.f32 %v337_v16, %v333_v63  ;;  %v340_v4 = vmul.f32 %v337_v16, %v334_v0 }
 0x115   :  { %v341_v6 = vadd.f32 %v339_v3, %v327_v1  ;;  %v342_v8 = vadd.f32 %v340_v4, %v328_v2  ;;  %v361_v9 = vpop.permute.xlu1 %360 }
 0x116   :  { %v365_v18 = vsel %vm364_vm7, %v361_v9, %v363_v55  ;;  %v366_v19 = vsel %vm364_vm7, %v363_v55, %v361_v9 }
 0x117   :  { %v356_v10 = vmul.f32 %v349_v61, %v341_v6  ;;  %v357_v11 = vmul.f32 %v353_v62, %v342_v8  ;;  %v371_v28 = vmul.f32 %v800_v22, %v365_v18  ;;  %v372_v29 = vmul.f32 %v800_v22, %v366_v19 }
 0x118   :  { %v437_v22 = vrot.slane %v432_v38, %v770_v44 }
 0x119   :  { %v358_v20 = vadd.f32 %v356_v10, %v314_v52  ;;  %v359_v21 = vadd.f32 %v357_v11, %v315_v53  ;;  %v374_v24 = vpop.permute.xlu1 %373 }
 0x11a   :  { %v377_v16 = vsel %vm364_vm7, %v374_v24, %v376_v7  ;;  %v378_v27 = vsel %vm364_vm7, %v376_v7, %v374_v24 }
 0x11b   :  { %v383_v30 = vmul.f32 %v798_v5, %v377_v16  ;;  %v384_v31 = vmul.f32 %v798_v5, %v378_v27 }
 0x11d   :  { %v385_v32 = vadd.f32 %v383_v30, %v371_v28  ;;  %v386_v34 = vadd.f32 %v384_v31, %v372_v29  ;;  %v405_v35 = vpop.permute.xlu1 %404 }
 0x11e   :  { %v409_v40 = vsel %vm408_vm8, %v405_v35, %v407_v25  ;;  %v410_v41 = vsel %vm408_vm8, %v407_v25, %v405_v35 }
 0x11f   :  { %v400_v36 = vmul.f32 %v393_v26, %v385_v32  ;;  %v401_v37 = vmul.f32 %v397_v59, %v386_v34  ;;  %v415_v48 = vmul.f32 %v802_v23, %v409_v40  ;;  %v416_v12 = vmul.f32 %v802_v23, %v410_v41 }
 0x121   :  { %v418_v42 = vpop.permute.xlu1 %417  ;;  %v402_v43 = vadd.f32 %v400_v36, %v358_v20  ;;  %v403_v46 = vadd.f32 %v401_v37, %v359_v21 }
 0x122   :  { %v421_v13 = vsel %vm408_vm8, %v418_v42, %v420_v39  ;;  %v422_v5 = vsel %vm408_vm8, %v420_v39, %v418_v42 }
 0x123   :  { %v427_v33 = vmul.f32 %v811_v49, %v421_v13  ;;  %v428_v15 = vmul.f32 %v811_v49, %v422_v5 }
 0x125   :  { %v429_v14 = vadd.f32 %v427_v33, %v415_v48  ;;  %v430_v50 = vadd.f32 %v428_v15, %v416_v12 }
 0x127   :  { %v444_v51 = vmul.f32 %v437_v22, %v429_v14  ;;  %v445_v52 = vmul.f32 %v441_v47, %v430_v50 }
 0x129   :  { %v446_v53 = vadd.f32 %v444_v51, %v402_v43  ;;  %v447_v44 = vadd.f32 %v445_v52, %v403_v46 }
 0x12b   :  { %448 = vst [vmem:[#allocation7] sm:$0xff] %v446_v53  ;;  %449 = vst [vmem:[#allocation7 + $0x8] sm:$0xff] %v447_v44 }
 0x12c   :  { %571 = shalt.err (!%p568_p6)
}
 0x12d   :  { %s572_s27 = scalar_lea.hbm %s848_s4, 256 }
 0x12e   :  { %p573_p7 = scmp.ne.s32.totalorder %s848_s4, %s572_s27  ;;  %p576_p8 = scmp.lt.u32.totalorder %s572_s27, %s848_s4 }
 0x130   :  { %p578_p9 = pnand %p576_p8, %p573_p7 }
 0x132   :  { %581 = shalt.err (!%p578_p9)
}
 0x133   :  { %459 = dma.vmem_to_hbm [thread:$0]  %s457_s23, 256, %s848_s4, [#allocation4]  }
 0x134   :  { %586 = dma.done.wait [#allocation4], 256  }
 0x135   :  { %587 = vsyncadd [#allocation4], 4294967040 }
 0x136   :  { %463 = vsyncpa [#allocation3], 1 }
 0x137   :  { %464 = vsyncpa [#allocation6], 1 }
 0x138   :  { %465 = vsyncpa [#allocation4], 1 }

</bundles_post_ra>
